<compile_context>
chip_gen: v7x
topology: tpu7x:2x2x1
jax: 0.10.0
libtpu: 0.0.40
codegen_flags: <defaults>
</compile_context>

<pallas_src>
import functools

import jax
import jax.numpy as jnp
from jax.experimental import pallas as pl
from jax.experimental.pallas import tpu as pltpu

BN_EPS = 1e-5


# ----------------------------- Pallas kernels ------------------------------ #
def _conv_stats_kernel(p_ref, w_ref, a_ref, conv_ref, sum_ref, ssq_ref):
    """One M-tile of the binarized conv (as matmul) + per-channel stat accumulation.

    p_ref   : (K, tm)   bf16  signed im2col patches (values in {-1, 0, +1})
    w_ref   : (Cout, K) bf16  sign(W)^T
    a_ref   : (Cout, 1) f32   alpha = mean(|W|) per output channel
    conv_ref: (Cout, tm) f32  conv output tile
    sum_ref : (Cout, 1) f32   resident accumulator: sum over M
    ssq_ref : (Cout, 1) f32   resident accumulator: sum of squares over M
    """
    acc = jnp.dot(w_ref[...], p_ref[...], preferred_element_type=jnp.float32)  # (Cout, tm)
    y = acc * a_ref[...]                       # post-matmul alpha scale (exact, f32)
    conv_ref[...] = y

    @pl.when(pl.program_id(0) == 0)
    def _():
        sum_ref[...] = jnp.zeros_like(sum_ref)
        ssq_ref[...] = jnp.zeros_like(ssq_ref)

    sum_ref[...] += jnp.sum(y, axis=1, keepdims=True)       # lane reduction (XLU)
    ssq_ref[...] += jnp.sum(y * y, axis=1, keepdims=True)


def _bn_residual_kernel(conv_ref, sum_ref, ssq_ref, g_ref, b_ref, r_ref, o_ref, *, inv_m):
    """One M-tile of BatchNorm (batch stats) + affine + residual add.

    conv_ref: (Cout, tm) f32   conv output tile
    sum_ref/ssq_ref: (Cout, 1) f32 completed batch statistics (sum, sum of squares)
    g_ref/b_ref: (Cout, 1) f32 gamma / beta
    r_ref   : (Cout, tm) f32   residual tile
    o_ref   : (Cout, tm) f32   output tile
    """
    mean = sum_ref[...] * inv_m
    var = ssq_ref[...] * inv_m - mean * mean                 # biased variance (PyTorch norm)
    scale = g_ref[...] * jax.lax.rsqrt(var + BN_EPS)         # (Cout, 1)
    shift = b_ref[...] - mean * scale
    o_ref[...] = conv_ref[...] * scale + shift + r_ref[...]


# ----------------------------- pallas_call glue ----------------------------- #
def _conv_stats_call(patches_km, w_sign_t, alpha, tm, n_m):
    K, M_pad = patches_km.shape
    cout = w_sign_t.shape[0]
    return pl.pallas_call(
        _conv_stats_kernel,
        out_shape=(
            jax.ShapeDtypeStruct((cout, M_pad), jnp.float32),
            jax.ShapeDtypeStruct((cout, 1), jnp.float32),
            jax.ShapeDtypeStruct((cout, 1), jnp.float32),
        ),
        grid=(n_m,),
        in_specs=[
            pl.BlockSpec((K, tm), lambda i: (0, i)),
            pl.BlockSpec((cout, K), lambda i: (0, 0)),
            pl.BlockSpec((cout, 1), lambda i: (0, 0)),
        ],
        out_specs=(
            pl.BlockSpec((cout, tm), lambda i: (0, i)),
            pl.BlockSpec((cout, 1), lambda i: (0, 0)),   # resident accumulator
            pl.BlockSpec((cout, 1), lambda i: (0, 0)),   # resident accumulator
        ),
        compiler_params=pltpu.CompilerParams(
            dimension_semantics=("arbitrary",)),         # shared stat accumulators -> serial axis
    )(patches_km, w_sign_t, alpha)


def _bn_residual_call(conv, s, ss, gamma, beta, resid, m_true, tm, n_m):
    cout, M_pad = conv.shape
    kernel = functools.partial(_bn_residual_kernel, inv_m=1.0 / float(m_true))
    return pl.pallas_call(
        kernel,
        out_shape=jax.ShapeDtypeStruct((cout, M_pad), jnp.float32),
        grid=(n_m,),
        in_specs=[
            pl.BlockSpec((cout, tm), lambda i: (0, i)),
            pl.BlockSpec((cout, 1), lambda i: (0, 0)),
            pl.BlockSpec((cout, 1), lambda i: (0, 0)),
            pl.BlockSpec((cout, 1), lambda i: (0, 0)),
            pl.BlockSpec((cout, 1), lambda i: (0, 0)),
            pl.BlockSpec((cout, tm), lambda i: (0, i)),
        ],
        out_specs=pl.BlockSpec((cout, tm), lambda i: (0, i)),
        compiler_params=pltpu.CompilerParams(
            dimension_semantics=("parallel",)),          # tiles independent -> both TCs on v7x
    )(conv, s, ss, gamma, beta, resid)


# ------------------------------- JAX wrapper -------------------------------- #
def _round_up(x, m):
    return (x + m - 1) // m * m


def _choose_tiling(m, tm_target=1024):
    """Pick an M tile (multiple of 128) and padded extent."""
    n_m = max(1, -(-m // tm_target))
    tm = _round_up(-(-m // n_m), 128)
    return tm, n_m, tm * n_m


def _extract_patches_km(xs_nhwc, stride):
    """Signed NHWC bf16 -> (K, M) bf16 im2col patches (3x3, padding=1), K ordered (kh, kw, cin)."""
    xp = jnp.pad(xs_nhwc, ((0, 0), (1, 1), (1, 1), (0, 0)))     # zeros stay zero (already signed)
    N, Hp, Wp, C = xp.shape
    Ho = (Hp - 3) // stride + 1
    Wo = (Wp - 3) // stride + 1
    pats = []
    for kh in range(3):
        for kw in range(3):
            sl = xp[:, kh:kh + stride * (Ho - 1) + 1:stride,
                       kw:kw + stride * (Wo - 1) + 1:stride, :]
            pats.append(sl)
    p = jnp.stack(pats, axis=0)                                  # (9, N, Ho, Wo, C)
    p = jnp.transpose(p, (0, 4, 1, 2, 3))                        # (9, C, N, Ho, Wo)
    return p.reshape(9 * C, N * Ho * Wo), (N, Ho, Wo)


def _stage(x_nhwc, w_oihw, gamma, beta, resid_cm, stride):
    """One BiRealConv2d_1w1a + BatchNorm2d (batch stats) + residual add.

    Returns output in (Cout, M) layout with M = N*Ho*Wo (C-major, then N, Ho, Wo).
    """
    cout = w_oihw.shape[0]

    # ---- binarize the weight ONCE (sign in bf16, alpha in f32, applied post-matmul) ----
    alpha = jnp.mean(jnp.abs(w_oihw), axis=(1, 2, 3)).astype(jnp.float32).reshape(cout, 1)
    w_mat = jnp.transpose(w_oihw, (2, 3, 1, 0)).reshape(-1, cout)      # (K, Cout), K=(kh,kw,cin)
    w_sign_t = jnp.sign(w_mat).T.astype(jnp.bfloat16)                  # (Cout, K)

    # ---- sign the activations ONCE, then im2col in lane-dense (K, M) layout ----
    xs = jnp.sign(x_nhwc.astype(jnp.float32)).astype(jnp.bfloat16)
    patches_km, (N, Ho, Wo) = _extract_patches_km(xs, stride)          # (K, M) bf16
    K, M = patches_km.shape

    tm, n_m, M_pad = _choose_tiling(M)
    if M_pad != M:
        # Zero-padded patch columns produce exactly-zero conv outputs -> they contribute 0 to the
        # sum / sum-of-squares accumulators, so dividing by the true M keeps statistics exact.
        patches_km = jnp.pad(patches_km, ((0, 0), (0, M_pad - M)))
        resid_cm = jnp.pad(resid_cm.astype(jnp.float32), ((0, 0), (0, M_pad - M)))
    else:
        resid_cm = resid_cm.astype(jnp.float32)

    conv, s, ss = _conv_stats_call(patches_km, w_sign_t, alpha, tm, n_m)
    g = gamma.astype(jnp.float32).reshape(cout, 1)
    b = beta.astype(jnp.float32).reshape(cout, 1)
    out = _bn_residual_call(conv, s, ss, g, b, resid_cm, M, tm, n_m)
    return out[:, :M], (N, Ho, Wo)


def basic_block_1w1a(x_nchw, params, *, stride, planes):
    """Forward of BasicBlock_1w1a (option 'A'). Input/output NCHW like PyTorch."""
    x = jnp.transpose(x_nchw, (0, 2, 3, 1)).astype(jnp.float32)        # NHWC
    N, H, W, in_planes = x.shape

    # shortcut (option 'A'): spatial ::2 subsample + zero-pad channels by planes//4 each side
    if stride != 1 or in_planes != planes:
        sc = x[:, ::2, ::2, :]
        padc = planes // 4
        sc = jnp.pad(sc, ((0, 0), (0, 0), (0, 0), (padc, padc)))
    else:
        sc = x
    sc_cm = jnp.transpose(sc, (3, 0, 1, 2)).reshape(planes, -1)        # (Cout, N*Ho*Wo)

    # stage 1: bn1(conv1(x)) + shortcut(x)
    out1_cm, (N, Ho, Wo) = _stage(x, params["w1"], params["g1"], params["b1"], sc_cm, stride)

    # stage 2: bn2(conv2(out1)) + out1
    out1_nhwc = jnp.transpose(out1_cm.reshape(planes, N, Ho, Wo), (1, 2, 3, 0))
    out2_cm, _ = _stage(out1_nhwc, params["w2"], params["g2"], params["b2"], out1_cm, 1)

    return jnp.transpose(out2_cm.reshape(planes, N, Ho, Wo), (1, 0, 2, 3))   # -> NCHW


# -------------------------- pure-JAX reference ----------------------------- #
def _ref_conv_bn(x_nhwc, w_oihw, gamma, beta, stride):
    alpha = jnp.mean(jnp.abs(w_oihw), axis=(1, 2, 3))
    wb = alpha[:, None, None, None] * jnp.sign(w_oihw)
    xb = jnp.sign(x_nhwc)
    w_hwio = jnp.transpose(wb, (2, 3, 1, 0))
    y = jax.lax.conv_general_dilated(
        xb, w_hwio, (stride, stride), padding=((1, 1), (1, 1)),
        dimension_numbers=("NHWC", "HWIO", "NHWC"))
    mean = jnp.mean(y, axis=(0, 1, 2))
    var = jnp.mean((y - mean) ** 2, axis=(0, 1, 2))
    return (y - mean) * jax.lax.rsqrt(var + BN_EPS) * gamma + beta


def ref_basic_block_1w1a(x_nchw, params, *, stride, planes):
    x = jnp.transpose(x_nchw, (0, 2, 3, 1)).astype(jnp.float32)
    in_planes = x.shape[-1]
    if stride != 1 or in_planes != planes:
        sc = x[:, ::2, ::2, :]
        padc = planes // 4
        sc = jnp.pad(sc, ((0, 0), (0, 0), (0, 0), (padc, padc)))
    else:
        sc = x
    out = _ref_conv_bn(x, params["w1"], params["g1"], params["b1"], stride) + sc
    x1 = out
    out = _ref_conv_bn(out, params["w2"], params["g2"], params["b2"], 1) + x1
    return jnp.transpose(out, (0, 3, 1, 2))


# --------------------------------- main ------------------------------------ #
if __name__ == "__main__":
    key = jax.random.PRNGKey(0)
    k_x, k_w1, k_w2, k_g1, k_b1, k_g2, k_b2 = jax.random.split(key, 7)

    N, in_planes, planes, H, W, stride = 2, 4, 8, 16, 16, 2

    x = jax.random.normal(k_x, (N, in_planes, H, W), dtype=jnp.float32)
    params = {
        "w1": jax.random.normal(k_w1, (planes, in_planes, 3, 3), dtype=jnp.float32) * 0.1,
        "w2": jax.random.normal(k_w2, (planes, planes, 3, 3), dtype=jnp.float32) * 0.1,
        "g1": 1.0 + 0.1 * jax.random.normal(k_g1, (planes,), dtype=jnp.float32),
        "b1": 0.1 * jax.random.normal(k_b1, (planes,), dtype=jnp.float32),
        "g2": 1.0 + 0.1 * jax.random.normal(k_g2, (planes,), dtype=jnp.float32),
        "b2": 0.1 * jax.random.normal(k_b2, (planes,), dtype=jnp.float32),
    }

    out = basic_block_1w1a(x, params, stride=stride, planes=planes)
    out = jax.block_until_ready(out)

    ref = jax.block_until_ready(ref_basic_block_1w1a(x, params, stride=stride, planes=planes))

    assert out.shape == (N, planes, H // stride, W // stride), out.shape
    assert jnp.allclose(out, ref, atol=1e-3, rtol=1e-3), float(jnp.max(jnp.abs(out - ref)))

    print("KERNEL_OK")
</pallas_src>

<mosaic_0001>
module attributes {stable_mosaic.version = 11 : i64} {
  func.func @_conv_stats_kernel(%arg0: i32, %arg1: memref<36x128xbf16, #tpu.memory_space<vmem>>, %arg2: memref<8x36xbf16, #tpu.memory_space<vmem>>, %arg3: memref<8x1xf32, #tpu.memory_space<vmem>>, %arg4: memref<8x128xf32, #tpu.memory_space<vmem>>, %arg5: memref<8x1xf32, #tpu.memory_space<vmem>>, %arg6: memref<8x1xf32, #tpu.memory_space<vmem>>) attributes {dimension_semantics = [#tpu.dimension_semantics<arbitrary>], iteration_bounds = array<i64: 1>, scalar_prefetch = 0 : i64, scratch_operands = 0 : i64, tpu.core_type = #tpu.core_type<tc>, window_params = [{transform_indices = @transform_0, window_bounds = array<i64: 36, 128>}, {pipeline_mode = #tpu.pipeline_mode<synchronous>, transform_indices = @transform_1, window_bounds = array<i64: 8, 36>}, {pipeline_mode = #tpu.pipeline_mode<synchronous>, transform_indices = @transform_2, window_bounds = array<i64: 8, 1>}, {transform_indices = @transform_3, window_bounds = array<i64: 8, 128>}, {pipeline_mode = #tpu.pipeline_mode<synchronous>, transform_indices = @transform_4, window_bounds = array<i64: 8, 1>}, {pipeline_mode = #tpu.pipeline_mode<synchronous>, transform_indices = @transform_5, window_bounds = array<i64: 8, 1>}]} {
    %c0 = arith.constant 0 : index
    %c0_0 = arith.constant 0 : index
    %0 = vector.load %arg2[%c0, %c0_0] : memref<8x36xbf16, #tpu.memory_space<vmem>>, vector<8x36xbf16>
    %c0_1 = arith.constant 0 : index
    %c0_2 = arith.constant 0 : index
    %1 = vector.load %arg1[%c0_1, %c0_2] : memref<36x128xbf16, #tpu.memory_space<vmem>>, vector<36x128xbf16>
    %cst = arith.constant dense<0.000000e+00> : vector<8x128xf32>
    %2 = tpu.matmul %0, %1, %cst {dimension_numbers = #tpu.dot_dimension_numbers<[1], [0], [0], [1], [0, 0, 1, 1], [], []>} : vector<8x36xbf16>, vector<36x128xbf16>, vector<8x128xf32> -> vector<8x128xf32>
    %c0_3 = arith.constant 0 : index
    %c0_4 = arith.constant 0 : index
    %3 = vector.load %arg3[%c0_3, %c0_4] : memref<8x1xf32, #tpu.memory_space<vmem>>, vector<8x1xf32>
    %4 = vector.broadcast %3 : vector<8x1xf32> to vector<8x128xf32>
    %5 = arith.mulf %2, %4 : vector<8x128xf32>
    %c0_5 = arith.constant 0 : index
    %c0_6 = arith.constant 0 : index
    %6 = vector.load %arg4[%c0_5, %c0_6] : memref<8x128xf32, #tpu.memory_space<vmem>>, vector<8x128xf32>
    tpu.vector_store %arg4[%c0_5, %c0_6], %5 {strides = array<i32>} : memref<8x128xf32, #tpu.memory_space<vmem>>, vector<8x128xf32>,
    %c0_i32 = arith.constant 0 : i32
    %7 = arith.cmpi eq, %arg0, %c0_i32 : i32
    %8 = arith.extui %7 : i1 to i32
    %c0_i32_7 = arith.constant 0 : i32
    %9 = arith.cmpi ne, %8, %c0_i32_7 : i32
    scf.if %9 {
      %cst_18 = arith.constant 0.000000e+00 : f32
      %21 = vector.broadcast %cst_18 : f32 to vector<8x1xf32>
      %c0_19 = arith.constant 0 : index
      %c0_20 = arith.constant 0 : index
      %22 = vector.load %arg5[%c0_19, %c0_20] : memref<8x1xf32, #tpu.memory_space<vmem>>, vector<8x1xf32>
      tpu.vector_store %arg5[%c0_19, %c0_20], %21 {strides = array<i32>} : memref<8x1xf32, #tpu.memory_space<vmem>>, vector<8x1xf32>,
      %cst_21 = arith.constant 0.000000e+00 : f32
      %23 = vector.broadcast %cst_21 : f32 to vector<8x1xf32>
      %c0_22 = arith.constant 0 : index
      %c0_23 = arith.constant 0 : index
      %24 = vector.load %arg6[%c0_22, %c0_23] : memref<8x1xf32, #tpu.memory_space<vmem>>, vector<8x1xf32>
      tpu.vector_store %arg6[%c0_22, %c0_23], %23 {strides = array<i32>} : memref<8x1xf32, #tpu.memory_space<vmem>>, vector<8x1xf32>,
    } else {
    }
    %c0_8 = arith.constant 0 : index
    %c0_9 = arith.constant 0 : index
    %10 = vector.load %arg5[%c0_8, %c0_9] : memref<8x1xf32, #tpu.memory_space<vmem>>, vector<8x1xf32>
    %cst_10 = arith.constant dense<0.000000e+00> : vector<8xf32>
    %11 = vector.multi_reduction <add>, %5, %cst_10 [1] : vector<8x128xf32> to vector<8xf32>
    %12 = vector.shape_cast %11 : vector<8xf32> to vector<8x1xf32>
    %13 = arith.addf %10, %12 : vector<8x1xf32>
    %c0_11 = arith.constant 0 : index
    %c0_12 = arith.constant 0 : index
    %14 = vector.load %arg5[%c0_11, %c0_12] : memref<8x1xf32, #tpu.memory_space<vmem>>, vector<8x1xf32>
    tpu.vector_store %arg5[%c0_11, %c0_12], %13 {strides = array<i32>} : memref<8x1xf32, #tpu.memory_space<vmem>>, vector<8x1xf32>,
    %c0_13 = arith.constant 0 : index
    %c0_14 = arith.constant 0 : index
    %15 = vector.load %arg6[%c0_13, %c0_14] : memref<8x1xf32, #tpu.memory_space<vmem>>, vector<8x1xf32>
    %16 = arith.mulf %5, %5 : vector<8x128xf32>
    %cst_15 = arith.constant dense<0.000000e+00> : vector<8xf32>
    %17 = vector.multi_reduction <add>, %16, %cst_15 [1] : vector<8x128xf32> to vector<8xf32>
    %18 = vector.shape_cast %17 : vector<8xf32> to vector<8x1xf32>
    %19 = arith.addf %15, %18 : vector<8x1xf32>
    %c0_16 = arith.constant 0 : index
    %c0_17 = arith.constant 0 : index
    %20 = vector.load %arg6[%c0_16, %c0_17] : memref<8x1xf32, #tpu.memory_space<vmem>>, vector<8x1xf32>
    tpu.vector_store %arg6[%c0_16, %c0_17], %19 {strides = array<i32>} : memref<8x1xf32, #tpu.memory_space<vmem>>, vector<8x1xf32>,
    return
  }
  func.func @transform_0(%arg0: i32) -> (i32, i32) {
    %c0_i32 = arith.constant 0 : i32
    %c0_i32_0 = arith.constant 0 : i32
    return %c0_i32, %arg0 : i32, i32
  }
  func.func @transform_1(%arg0: i32) -> (i32, i32) {
    %c0_i32 = arith.constant 0 : i32
    %c0_i32_0 = arith.constant 0 : i32
    %c0_i32_1 = arith.constant 0 : i32
    return %c0_i32, %c0_i32_0 : i32, i32
  }
  func.func @transform_2(%arg0: i32) -> (i32, i32) {
    %c0_i32 = arith.constant 0 : i32
    %c0_i32_0 = arith.constant 0 : i32
    %c0_i32_1 = arith.constant 0 : i32
    return %c0_i32, %c0_i32_0 : i32, i32
  }
  func.func @transform_3(%arg0: i32) -> (i32, i32) {
    %c0_i32 = arith.constant 0 : i32
    %c0_i32_0 = arith.constant 0 : i32
    return %c0_i32, %arg0 : i32, i32
  }
  func.func @transform_4(%arg0: i32) -> (i32, i32) {
    %c0_i32 = arith.constant 0 : i32
    %c0_i32_0 = arith.constant 0 : i32
    %c0_i32_1 = arith.constant 0 : i32
    return %c0_i32, %c0_i32_0 : i32, i32
  }
  func.func @transform_5(%arg0: i32) -> (i32, i32) {
    %c0_i32 = arith.constant 0 : i32
    %c0_i32_0 = arith.constant 0 : i32
    %c0_i32_1 = arith.constant 0 : i32
    return %c0_i32, %c0_i32_0 : i32, i32
  }
}

</mosaic_0001>

<bundles_post_ra>
// kernel: tpu_custom_call.1
= control target key start
LH: loop header
LB: loop body
LE: loop exit
PB: predicated region body
PF: predicated region fallthrough
CT: control target
= control target key end

     0   :  { %11 = vsyncpa [#allocation3], 0  ;;  %s318_s0 = inlined_call_operand.hbm [shape: bf16[36,128], index: 0, kind: input, shape index: {}]   ;;  %s319_s1 = inlined_call_operand.vmem [shape: bf16[8,36], index: 1, kind: input, shape index: {}]   ;;  %s320_s2 = inlined_call_operand.vmem [shape: f32[8,1], index: 2, kind: input, shape index: {}]   ;;  %s321_s3 = inlined_call_operand.hbm [shape: f32[8,128], index: 3, kind: output, shape index: {0}]   ;;  %s322_s4 = inlined_call_operand.vmem [shape: f32[8,1], index: 4, kind: output, shape index: {1}]   ;;  %s323_s5 = inlined_call_operand.vmem [shape: f32[8,1], index: 5, kind: output, shape index: {2}]  }
   0x1   :  { %12 = vsyncpa [#allocation4], 0  ;;  %s229_s18 = smov [#allocation2]   ;;  %s181_s22 = scalar_lea.hbm %s318_s0, 320 }
   0x2   :  { %s18_s19 = sshll.u32 %s229_s18, 4  ;;  %p182_p0 = scmp.ne.s32.totalorder %s318_s0, %s181_s22  ;;  %s19_s19 = int_to_ptr.vmem [resolvable:$true] %s18_s19 }
   0x3   :  { %p185_p1 = scmp.lt.u32.totalorder %s181_s22, %s318_s0 }
   0x5   :  { %p187_p2 = pnand %p185_p1, %p182_p0 }
   0x7   :  { %190 = shalt.err (!%p187_p2)
}
   0x8   :  { %s191_s27 = scalar_lea.vmem %s19_s19, 320  ;;  %p196_p4 = scmp.lt.s32.totalorder %s19_s19, %s19_s19 }
   0x9   :  { %p192_p3 = scmp.ne.s32.totalorder %s19_s19, %s191_s27  ;;  %p197_p5 = scmp.lt.s32.totalorder %s191_s27, %s191_s27 }
   0xb   :  { %p198_p6 = por %p197_p5, %p196_p4 }
   0xd   :  { %p199_p7 = pnand %p198_p6, %p192_p3 }
   0xf   :  { %202 = shalt.err (!%p199_p7)
}
  0x10   :  { %s230_s28 = smov 64   ;;  %s231_s29 = smov 4  }
  0x11   :  { %24 = dma.hbm_to_vmem [thread:$0]  %s318_s0, 320, %s19_s19, [#allocation3], %s230_s28, %s230_s28, %s231_s29  }
  0x12   :  { %225 = dma.done.wait [#allocation3], 320  }
  0x13   :  { %226 = vsyncadd [#allocation3], 4294966976  ;;  %v232_v0 = vmov 0.0   ;;  %vm233_vm0 = vmmov 0   ;;  %v234_v1 = vmov 0   ;;  %v178_v2 = vld [vmem:[#allocation2] sm:$0xff]  }
  0x14   :  { %160 = vmatprep.subr.bf16.mxu0 %v232_v0  ;;  %166 = vmatprep.mubr.msk.bf16.mxu0 %vm233_vm0, %v232_v0  ;;  %v179_v3 = vld [vmem:[#allocation2 + $0x8] sm:$0xff]   ;;  %v102_v4 = vld [vmem:[%s320_s2] sm:$0xff]  ;;  %v180_v5 = vld [vmem:[#allocation2 + $0x10] ss:$0 sps:$4 sm:$0x33]   ;;  %vm58_vm1 = vcmask 1041408  }
  0x15   :  { %177 = vset.pattern.permute.xlu0 %v234_v1  ;;  %161 = vmatpush3.bf16.msra.mxu0 %v178_v2  ;;  %v60_v6 = vsel %vm58_vm1, %v180_v5, 0  ;;  %v33_v7 = vld [vmem:[%s319_s1] sm:$0xf]  ;;  %vm54_vm2 = vcmask 293888   ;;  %vm114_vm3 = vcmask 7168   ;;  %s235_s1 = smov [#allocation5]  }
  0x16   :  { %162 = vmatprep.subr.bf16.mxu0 %v232_v0  ;;  %105 = vperm.xlu0 %177, %v102_v4   ;;  %115 = vst.msk [vmem:[%s322_s4] sm:$0xff] %vm114_vm3, %v232_v0  ;;  %116 = vst.msk [vmem:[%s323_s5] sm:$0xff] %vm114_vm3, %v232_v0  ;;  %s135_s13 = sshll.u32 %s235_s1, 4  ;;  %s136_s13 = int_to_ptr.vmem [resolvable:$true] %s135_s13 }
  0x17   :  { %s203_s14 = scalar_lea.vmem %s136_s13, 128  ;;  %p208_p9 = scmp.lt.s32.totalorder %s136_s13, %s136_s13 }
  0x18   :  { %p204_p8 = scmp.ne.s32.totalorder %s136_s13, %s203_s14  ;;  %p209_p10 = scmp.lt.s32.totalorder %s203_s14, %s203_s14 }
  0x19   :  { %163 = vmatpush3.bf16.msra.mxu0 %v179_v3 }
  0x1a   :  { %164 = vmatprep.subr.bf16.mxu0 %v232_v0  ;;  %p210_p11 = por %p209_p10, %p208_p9 }
  0x1c   :  { %p211_p12 = pnand %p210_p11, %p204_p8 }
  0x1d   :  { %165 = vmatpush3.bf16.msra.mxu0 %v60_v6 }
  0x20   :  { %167 = vmatmul.mubr.msk.bf16.vlgmr.msra.gmra.mrb[0].mxu0 %vm54_vm2, %v33_v7 }
  0x95   :  { %v106_v8 = vpop.permute.xlu0 %105 }
  0xf3   :  { %v96_v9 = vpop.f32.mrb[0].mxu0 }
  0xf4   :  { %v108_v10 = vmul.f32 %v106_v8, %v96_v9  ;;  %v168_v11 = vpop.f32.mrb[1].mxu0 }
  0xf5   :  { %v99_v12 = vpop.f32.mrb[2].mxu0 }
  0xf6   :  { %109 = vst [vmem:[#allocation5] sm:$0xff] %v108_v10  ;;  %118 = vadd.xlane.f32.xlu0 %v108_v10  ;;  %v169_v13 = vpop.f32.mrb[3].mxu0  ;;  %v124_v14 = vmul.f32 %v108_v10, %v108_v10 }
  0xf8   :  { %125 = vadd.xlane.f32.xlu1 %v124_v14 }
  0xf9   :  { %214 = shalt.err (!%p211_p12)
}
  0xfa   :  { %s215_s17 = scalar_lea.hbm %s321_s3, 128 }
  0xfb   :  { %p216_p13 = scmp.ne.s32.totalorder %s321_s3, %s215_s17  ;;  %p219_p0 = scmp.lt.u32.totalorder %s215_s17, %s321_s3 }
  0xfd   :  { %p221_p1 = pnand %p219_p0, %p216_p13 }
  0xff   :  { %224 = shalt.err (!%p221_p1)
}
 0x100   :  { %138 = dma.vmem_to_hbm [thread:$0]  %s136_s13, 128, %s321_s3, [#allocation4]   ;;  %v117_v15 = vld [vmem:[%s322_s4] sm:$0xff] }
 0x101   :  { %v123_v17 = vld [vmem:[%s323_s5] sm:$0xff] }
 0x183   :  { %v119_v16 = vpop.xlane.xlu0 %118 }
 0x184   :  { %v120_v18 = vadd.f32 %v119_v16, %v117_v15 }
 0x185   :  { %v126_v19 = vpop.xlane.xlu1 %125 }
 0x186   :  { %122 = vst.msk [vmem:[%s322_s4] sm:$0xff] %vm114_vm3, %v120_v18  ;;  %v127_v20 = vadd.f32 %v126_v19, %v123_v17 }
 0x188   :  { %128 = vst.msk [vmem:[%s323_s5] sm:$0xff] %vm114_vm3, %v127_v20 }
 0x189   :  { %227 = dma.done.wait [#allocation4], 128  }
 0x18a   :  { %228 = vsyncadd [#allocation4], 4294967168 }
 0x18b   :  { %150 = vsyncpa [#allocation3], 1 }
 0x18c   :  { %151 = vsyncpa [#allocation4], 1 }

</bundles_post_ra>
